<compile_context>
chip_gen: v7x
topology: tpu7x:2x2x1
jax: 0.10.0
libtpu: 0.0.40
codegen_flags: <defaults>
</compile_context>

<pallas_src>
import functools
import math

import jax
import jax.numpy as jnp
from jax.experimental import pallas as pl
from jax.experimental.pallas import tpu as pltpu

LANES = 128
MAX_TILE_ROWS = 4096      # (4096, 128) f32 block = 2 MiB per pipeline buffer
MAX_SLICES = 2            # leading "parallel" axis -> both TCs on v7x


def _sublane_multiple(dtype) -> int:
    # Minimum second-to-last tile multiple for the dtype (f32:8, bf16:16, 8-bit:32).
    itemsize = jnp.dtype(dtype).itemsize
    return max(8, 32 // itemsize)


def _wing_partial_kernel(o_ref, t_ref, acc_ref, *, width, curvature, c,
                         rows, tile_rows, inner_steps, needs_mask):
    p = pl.program_id(0)      # core-split slice
    i = pl.program_id(1)      # reduction step within the slice

    @pl.when(i == 0)
    def _():
        acc_ref[...] = jnp.zeros_like(acc_ref)

    diff_abs = jnp.abs(t_ref[...].astype(jnp.float32)
                       - o_ref[...].astype(jnp.float32))
    loss = jnp.where(diff_abs < width,
                     width * jnp.log1p(diff_abs / curvature),   # |d| <  width
                     diff_abs - c)                              # |d| >= width

    if needs_mask:
        # Virtual (unclamped) block index: masks both the ragged trailing block
        # and any fully-virtual duplicate step introduced by the core split.
        virt_block = p * inner_steps + i
        row_in_tile = jax.lax.broadcasted_iota(jnp.int32, loss.shape, 0)
        global_row = virt_block * tile_rows + row_in_tile
        loss = jnp.where(global_row < rows, loss, 0.0)

    # (tile_rows, 128) -> (tile_rows//8, 8, 128) -> (8, 128): pure vreg adds on
    # the VPU (sublane layout preserved); final cross-lane reduce in wrapper.
    partial = loss.reshape(tile_rows // 8, 8, LANES).sum(axis=0)
    acc_ref[...] += partial[None, :, :]


def wing_loss_pallas(outputs, targets, width: int = 5, curvature: float = 0.5,
                     reduction: str = "mean"):
    """Pallas-TPU wing loss matching catalyst's `wing_loss` semantics."""
    assert outputs.shape == targets.shape
    width_f = float(width)
    curvature_f = float(curvature)
    c = width_f - width_f * math.log(1.0 + width_f / curvature_f)

    n_elem = outputs.size
    # Contiguous ravel: metadata-only, no HBM copy, no dtype change.
    o_flat = jnp.ravel(outputs)
    t_flat = jnp.ravel(targets)

    sub = _sublane_multiple(outputs.dtype)
    rows = (n_elem // LANES) // sub * sub      # main rows, multiple of `sub`
    n_main = rows * LANES
    tail = n_elem - n_main                     # < sub*LANES leftover elements

    total = jnp.float32(0.0)

    if rows > 0:
        tile_rows = min(MAX_TILE_ROWS, rows)   # multiple of `sub` (>= 8)
        total_blocks = pl.cdiv(rows, tile_rows)
        # Never spawn more slices than there are real blocks (avoids a wasted
        # fully-virtual grid step on small inputs / 1-TC chips).
        num_slices = min(MAX_SLICES, total_blocks)
        inner_steps = pl.cdiv(total_blocks, num_slices)
        virtual_blocks = num_slices * inner_steps
        needs_mask = (virtual_blocks * tile_rows) != rows

        # When tail == 0 this is a pure reshape (no copy); otherwise only the
        # main prefix is materialized once for the kernel.
        o2d = o_flat[:n_main].reshape(rows, LANES)
        t2d = t_flat[:n_main].reshape(rows, LANES)

        if virtual_blocks == total_blocks:
            row_block = lambda p, i: (p * inner_steps + i, 0)
        else:
            # Clamp so the duplicate virtual step never starts a DMA out of
            # bounds; its contribution is zeroed by the in-kernel mask.
            row_block = lambda p, i: (
                jnp.minimum(p * inner_steps + i, total_blocks - 1), 0)

        kernel = functools.partial(
            _wing_partial_kernel, width=width_f, curvature=curvature_f, c=c,
            rows=rows, tile_rows=tile_rows, inner_steps=inner_steps,
            needs_mask=needs_mask)

        partials = pl.pallas_call(
            kernel,
            out_shape=jax.ShapeDtypeStruct((num_slices, 8, LANES), jnp.float32),
            grid_spec=pltpu.PrefetchScalarGridSpec(
                num_scalar_prefetch=0,
                grid=(num_slices, inner_steps),
                in_specs=[
                    pl.BlockSpec((tile_rows, LANES), row_block),
                    pl.BlockSpec((tile_rows, LANES), row_block),
                ],
                out_specs=pl.BlockSpec((1, 8, LANES), lambda p, i: (p, 0, 0)),
            ),
            compiler_params=pltpu.CompilerParams(
                dimension_semantics=("parallel", "arbitrary")),
        )(o2d, t2d)

        total = total + jnp.sum(partials)

    if tail > 0:
        # Tiny ragged remainder: plain-JAX path (negligible traffic).
        d = jnp.abs(t_flat[n_main:].astype(jnp.float32)
                    - o_flat[n_main:].astype(jnp.float32))
        tail_loss = jnp.where(d < width_f,
                              width_f * jnp.log1p(d / curvature_f),
                              d - c)
        total = total + jnp.sum(tail_loss)

    if reduction == "sum":
        return total
    if reduction == "mean":
        return total / jnp.float32(n_elem)
    # TODO(synk): elementwise (reduction='none') variant would return the full loss map.
    raise ValueError(f"unsupported reduction: {reduction}")


def wing_loss_ref(outputs, targets, width=5, curvature=0.5, reduction="mean"):
    """Pure-JAX reference, mirrors the PyTorch implementation."""
    width = float(width)
    diff_abs = jnp.abs(targets.astype(jnp.float32) - outputs.astype(jnp.float32))
    c = width - width * math.log(1.0 + width / curvature)
    loss = jnp.where(diff_abs < width,
                     width * jnp.log1p(diff_abs / curvature),
                     diff_abs - c)
    if reduction == "sum":
        return jnp.sum(loss)
    if reduction == "mean":
        return jnp.mean(loss)
    return loss


if __name__ == "__main__":
    key = jax.random.PRNGKey(0)
    k1, k2, k3, k4 = jax.random.split(key, 4)

    # Primary check: batch=2, channels=4, 16x16 spatial (NCHW-like prediction).
    shape = (2, 4, 16, 16)
    outputs = jax.random.normal(k1, shape, dtype=jnp.float32) * 4.0
    targets = jax.random.normal(k2, shape, dtype=jnp.float32) * 4.0

    loss = wing_loss_pallas(outputs, targets, width=5, curvature=0.5,
                            reduction="mean")
    loss = jax.block_until_ready(loss)
    ref = wing_loss_ref(outputs, targets, width=5, curvature=0.5,
                        reduction="mean")
    assert jnp.allclose(loss, ref, rtol=1e-5, atol=1e-5), (loss, ref)

    # Secondary check: ragged size (exercises the in-kernel mask + jnp tail).
    shape2 = (2, 3, 40, 40)   # 9600 elements, not a multiple of 8*128
    o2 = jax.random.normal(k3, shape2, dtype=jnp.float32) * 4.0
    t2 = jax.random.normal(k4, shape2, dtype=jnp.float32) * 4.0
    loss2 = jax.block_until_ready(
        wing_loss_pallas(o2, t2, width=5, curvature=0.5, reduction="sum"))
    ref2 = wing_loss_ref(o2, t2, width=5, curvature=0.5, reduction="sum")
    assert jnp.allclose(loss2, ref2, rtol=1e-5, atol=1e-4), (loss2, ref2)

    print("KERNEL_OK")
</pallas_src>

<mosaic_0001>
module attributes {stable_mosaic.version = 11 : i64} {
  func.func @_wing_partial_kernel(%arg0: i32, %arg1: i32, %arg2: memref<16x128xf32, #tpu.memory_space<vmem>>, %arg3: memref<16x128xf32, #tpu.memory_space<vmem>>, %arg4: memref<1x8x128xf32, #tpu.memory_space<vmem>>) attributes {dimension_semantics = [#tpu.dimension_semantics<parallel>, #tpu.dimension_semantics<arbitrary>], iteration_bounds = array<i64: 1, 1>, scalar_prefetch = 0 : i64, scratch_operands = 0 : i64, tpu.core_type = #tpu.core_type<tc>, window_params = [{transform_indices = @transform_0, window_bounds = array<i64: 16, 128>}, {transform_indices = @transform_1, window_bounds = array<i64: 16, 128>}, {transform_indices = @transform_2, window_bounds = array<i64: 1, 8, 128>}]} {
    %c0_i32 = arith.constant 0 : i32
    %0 = arith.cmpi eq, %arg1, %c0_i32 : i32
    %1 = arith.extui %0 : i1 to i32
    %c0_i32_0 = arith.constant 0 : i32
    %2 = arith.cmpi ne, %1, %c0_i32_0 : i32
    scf.if %2 {
      %cst_14 = arith.constant 0.000000e+00 : f32
      %23 = vector.broadcast %cst_14 : f32 to vector<1x8x128xf32>
      %c0_15 = arith.constant 0 : index
      %c0_16 = arith.constant 0 : index
      %c0_17 = arith.constant 0 : index
      %24 = vector.load %arg4[%c0_15, %c0_16, %c0_17] : memref<1x8x128xf32, #tpu.memory_space<vmem>>, vector<1x8x128xf32>
      tpu.vector_store %arg4[%c0_15, %c0_16, %c0_17], %23 {strides = array<i32>} : memref<1x8x128xf32, #tpu.memory_space<vmem>>, vector<1x8x128xf32>,
    } else {
    }
    %c0 = arith.constant 0 : index
    %c0_1 = arith.constant 0 : index
    %3 = vector.load %arg3[%c0, %c0_1] : memref<16x128xf32, #tpu.memory_space<vmem>>, vector<16x128xf32>
    %c0_2 = arith.constant 0 : index
    %c0_3 = arith.constant 0 : index
    %4 = vector.load %arg2[%c0_2, %c0_3] : memref<16x128xf32, #tpu.memory_space<vmem>>, vector<16x128xf32>
    %5 = arith.subf %3, %4 : vector<16x128xf32>
    %6 = math.absf %5 : vector<16x128xf32>
    %cst = arith.constant 5.000000e+00 : f32
    %7 = vector.broadcast %cst : f32 to vector<16x128xf32>
    %8 = arith.cmpf olt, %6, %7 : vector<16x128xf32>
    %cst_4 = arith.constant 5.000000e-01 : f32
    %9 = vector.broadcast %cst_4 : f32 to vector<16x128xf32>
    %10 = arith.divf %6, %9 : vector<16x128xf32>
    %11 = math.log1p %10 : vector<16x128xf32>
    %cst_5 = arith.constant 5.000000e+00 : f32
    %12 = vector.broadcast %cst_5 : f32 to vector<16x128xf32>
    %13 = arith.mulf %12, %11 : vector<16x128xf32>
    %cst_6 = arith.constant -6.9894762 : f32
    %14 = vector.broadcast %cst_6 : f32 to vector<16x128xf32>
    %15 = arith.subf %6, %14 : vector<16x128xf32>
    %16 = arith.select %8, %13, %15 : vector<16x128xi1>, vector<16x128xf32>
    %17 = vector.shape_cast %16 : vector<16x128xf32> to vector<2x8x128xf32>
    %cst_7 = arith.constant dense<0.000000e+00> : vector<8x128xf32>
    %18 = vector.multi_reduction <add>, %17, %cst_7 [0] : vector<2x8x128xf32> to vector<8x128xf32>
    %c0_8 = arith.constant 0 : index
    %c0_9 = arith.constant 0 : index
    %c0_10 = arith.constant 0 : index
    %19 = vector.load %arg4[%c0_8, %c0_9, %c0_10] : memref<1x8x128xf32, #tpu.memory_space<vmem>>, vector<1x8x128xf32>
    %20 = vector.shape_cast %18 : vector<8x128xf32> to vector<1x8x128xf32>
    %21 = arith.addf %19, %20 : vector<1x8x128xf32>
    %c0_11 = arith.constant 0 : index
    %c0_12 = arith.constant 0 : index
    %c0_13 = arith.constant 0 : index
    %22 = vector.load %arg4[%c0_11, %c0_12, %c0_13] : memref<1x8x128xf32, #tpu.memory_space<vmem>>, vector<1x8x128xf32>
    tpu.vector_store %arg4[%c0_11, %c0_12, %c0_13], %21 {strides = array<i32>} : memref<1x8x128xf32, #tpu.memory_space<vmem>>, vector<1x8x128xf32>,
    return
  }
  func.func @transform_0(%arg0: i32, %arg1: i32) -> (i32, i32) {
    %c1_i32 = arith.constant 1 : i32
    %0 = arith.muli %arg0, %c1_i32 : i32
    %1 = arith.addi %0, %arg1 : i32
    %c0_i32 = arith.constant 0 : i32
    %c0_i32_0 = arith.constant 0 : i32
    return %1, %c0_i32 : i32, i32
  }
  func.func @transform_1(%arg0: i32, %arg1: i32) -> (i32, i32) {
    %c1_i32 = arith.constant 1 : i32
    %0 = arith.muli %arg0, %c1_i32 : i32
    %1 = arith.addi %0, %arg1 : i32
    %c0_i32 = arith.constant 0 : i32
    %c0_i32_0 = arith.constant 0 : i32
    return %1, %c0_i32 : i32, i32
  }
  func.func @transform_2(%arg0: i32, %arg1: i32) -> (i32, i32, i32) {
    %c0_i32 = arith.constant 0 : i32
    %c0_i32_0 = arith.constant 0 : i32
    %c0_i32_1 = arith.constant 0 : i32
    return %arg0, %c0_i32, %c0_i32_0 : i32, i32, i32
  }
}

</mosaic_0001>

<bundles_post_ra>
// kernel: tpu_custom_call.1
= control target key start
LH: loop header
LB: loop body
LE: loop exit
PB: predicated region body
PF: predicated region fallthrough
CT: control target
= control target key end

     0   :  { %7 = vsyncpa [#allocation3], 0  ;;  %s254_s0 = inlined_call_operand.hbm [shape: f32[16,128], index: 0, kind: input, shape index: {}]   ;;  %s255_s1 = inlined_call_operand.hbm [shape: f32[16,128], index: 1, kind: input, shape index: {}]   ;;  %s256_s2 = inlined_call_operand.hbm [shape: f32[1,8,128], index: 2, kind: output, shape index: {}]  }
   0x1   :  { %8 = vsyncpa [#allocation6], 0 }
   0x2   :  { %9 = vsyncpa [#allocation4], 0  ;;  %s198_s9 = smov [#allocation2]   ;;  %s126_s13 = scalar_lea.hbm %s254_s0, 256 }
   0x3   :  { %s19_s10 = sshll.u32 %s198_s9, 4  ;;  %p127_p0 = scmp.ne.s32.totalorder %s254_s0, %s126_s13  ;;  %s20_s10 = int_to_ptr.vmem [resolvable:$true] %s19_s10 }
   0x4   :  { %p130_p1 = scmp.lt.u32.totalorder %s126_s13, %s254_s0 }
   0x6   :  { %p132_p2 = pnand %p130_p1, %p127_p0 }
   0x8   :  { %135 = shalt.err (!%p132_p2)
}
   0x9   :  { %s136_s18 = scalar_lea.vmem %s20_s10, 256  ;;  %p141_p4 = scmp.lt.s32.totalorder %s20_s10, %s20_s10 }
   0xa   :  { %p137_p3 = scmp.ne.s32.totalorder %s20_s10, %s136_s18  ;;  %p142_p5 = scmp.lt.s32.totalorder %s136_s18, %s136_s18 }
   0xc   :  { %p143_p6 = por %p142_p5, %p141_p4 }
   0xe   :  { %p144_p7 = pnand %p143_p6, %p137_p3 }
  0x10   :  { %147 = shalt.err (!%p144_p7)
}
  0x11   :  { %s199_s19 = smov 128   ;;  %s200_s20 = smov 8  }
  0x12   :  { %25 = dma.hbm_to_vmem [thread:$0]  %s254_s0, 256, %s20_s10, [#allocation3], %s199_s19, %s199_s19, %s200_s20  }
  0x13   :  { %s201_s23 = smov [#allocation5]   ;;  %s148_s27 = scalar_lea.hbm %s255_s1, 256 }
  0x14   :  { %s35_s24 = sshll.u32 %s201_s23, 4  ;;  %p149_p8 = scmp.ne.s32.totalorder %s255_s1, %s148_s27  ;;  %s36_s24 = int_to_ptr.vmem [resolvable:$true] %s35_s24 }
  0x15   :  { %p152_p9 = scmp.lt.u32.totalorder %s148_s27, %s255_s1 }
  0x17   :  { %p154_p10 = pnand %p152_p9, %p149_p8 }
  0x19   :  { %157 = shalt.err (!%p154_p10)
}
  0x1a   :  { %s158_s4 = scalar_lea.vmem %s36_s24, 256  ;;  %p163_p12 = scmp.lt.s32.totalorder %s36_s24, %s36_s24 }
  0x1b   :  { %p159_p11 = scmp.ne.s32.totalorder %s36_s24, %s158_s4  ;;  %p164_p13 = scmp.lt.s32.totalorder %s158_s4, %s158_s4 }
  0x1d   :  { %p165_p0 = por %p164_p13, %p163_p12 }
  0x1f   :  { %p166_p1 = pnand %p165_p0, %p159_p11 }
  0x21   :  { %169 = shalt.err (!%p166_p1)
}
  0x22   :  { %41 = dma.hbm_to_vmem [thread:$0]  %s255_s1, 256, %s36_s24, [#allocation6], %s199_s19, %s199_s19, %s200_s20  }
  0x23   :  { %192 = dma.done.wait [#allocation3], 256  }
  0x24   :  { %193 = vsyncadd [#allocation3], 4294967040 }
  0x25   :  { %194 = dma.done.wait [#allocation6], 256  }
  0x26   :  { %195 = vsyncadd [#allocation6], 4294967040  ;;  %v57_v0 = vld [vmem:[#allocation5] sm:$0xff]  ;;  %v58_v1 = vld [vmem:[#allocation5 + $0x8] sm:$0xff]  ;;  %s202_s1 = smov [#allocation7]  }
  0x27   :  { %v59_v2 = vld [vmem:[#allocation2] sm:$0xff]  ;;  %v60_v3 = vld [vmem:[#allocation2 + $0x8] sm:$0xff]  ;;  %s104_s6 = sshll.u32 %s202_s1, 4  ;;  %s105_s6 = int_to_ptr.vmem [resolvable:$true] %s104_s6 }
  0x28   :  { %v61_v4 = vsub.f32 %v57_v0, %v59_v2  ;;  %v62_v5 = vsub.f32 %v58_v1, %v60_v3  ;;  %s170_s7 = scalar_lea.vmem %s105_s6, 128  ;;  %p175_p3 = scmp.lt.s32.totalorder %s105_s6, %s105_s6 }
  0x29   :  { %p171_p2 = scmp.ne.s32.totalorder %s105_s6, %s170_s7  ;;  %p176_p4 = scmp.lt.s32.totalorder %s170_s7, %s170_s7 }
  0x2a   :  { %v63_v6 = vand.u32 2147483647, %v61_v4  ;;  %v64_v7 = vand.u32 2147483647, %v62_v5 }
  0x2b   :  { %p177_p5 = por %p176_p4, %p175_p3 }
  0x2c   :  { %v68_v8 = vmul.f32 2.0, %v63_v6  ;;  %v69_v9 = vmul.f32 2.0, %v64_v7  ;;  %v114_v24 = vadd.f32 6.989476, %v63_v6  ;;  %vm65_vm2 = vcmp.lt.f32.partialorder %v63_v6, 5.0 }
  0x2d   :  { %v115_v26 = vadd.f32 6.989476, %v64_v7  ;;  %vm66_vm3 = vcmp.lt.f32.partialorder %v64_v7, 5.0  ;;  %p178_p6 = pnand %p177_p5, %p171_p2 }
  0x2e   :  { %v70_v10 = vadd.f32 1.0, %v68_v8  ;;  %v79_v11 = vadd.f32 1.0, %v69_v9  ;;  %v73_v12 = vmul.f32 -0.5, %v68_v8  ;;  %v82_v13 = vmul.f32 -0.5, %v69_v9 }
  0x2f   :  { %v76_v15 = vand.u32 2147483647, %v68_v8  ;;  %v85_v17 = vand.u32 2147483647, %v69_v9 }
  0x30   :  { %122 = vlog2.f32 %v70_v10  ;;  %v74_v14 = vadd.f32 1.0, %v73_v12  ;;  %v83_v16 = vadd.f32 1.0, %v82_v13 }
  0x31   :  { %124 = vlog2.f32 %v79_v11  ;;  %vm77_vm0 = vcmp.lt.f32.partialorder %v76_v15, 0.0004427343  ;;  %vm86_vm1 = vcmp.lt.f32.partialorder %v85_v17, 0.0004427343 }
  0x32   :  { %v75_v18 = vmul.f32 %v74_v14, %v68_v8  ;;  %v84_v20 = vmul.f32 %v83_v16, %v69_v9 }
  0x3a   :  { %v123_v19 = vpop.eup %122 }
  0x3b   :  { %v125_v21 = vpop.eup %124  ;;  %v72_v22 = vmul.f32 0.6931472, %v123_v19 }
  0x3c   :  { %v81_v23 = vmul.f32 0.6931472, %v125_v21 }
  0x3d   :  { %v78_v25 = vsel %vm77_vm0, %v75_v18, %v72_v22 }
  0x3e   :  { %v87_v27 = vsel %vm86_vm1, %v84_v20, %v81_v23  ;;  %v88_v28 = vmul.f32 5.0, %v78_v25 }
  0x3f   :  { %v89_v29 = vmul.f32 5.0, %v87_v27 }
  0x40   :  { %v92_v30 = vsel %vm65_vm2, %v88_v28, %v114_v24 }
  0x41   :  { %v93_v31 = vsel %vm66_vm3, %v89_v29, %v115_v26 }
  0x42   :  { %v94_v32 = vadd.f32 %v93_v31, %v92_v30 }
  0x44   :  { %97 = vst [vmem:[#allocation7] sm:$0xff] %v94_v32 }
  0x45   :  { %181 = shalt.err (!%p178_p6)
}
  0x46   :  { %s182_s10 = scalar_lea.hbm %s256_s2, 128 }
  0x47   :  { %p183_p7 = scmp.ne.s32.totalorder %s256_s2, %s182_s10  ;;  %p186_p8 = scmp.lt.u32.totalorder %s182_s10, %s256_s2 }
  0x49   :  { %p188_p9 = pnand %p186_p8, %p183_p7 }
  0x4b   :  { %191 = shalt.err (!%p188_p9)
}
  0x4c   :  { %107 = dma.vmem_to_hbm [thread:$0]  %s105_s6, 128, %s256_s2, [#allocation4]  }
  0x4d   :  { %196 = dma.done.wait [#allocation4], 128  }
  0x4e   :  { %197 = vsyncadd [#allocation4], 4294967168 }
  0x4f   :  { %111 = vsyncpa [#allocation3], 1 }
  0x50   :  { %112 = vsyncpa [#allocation6], 1 }
  0x51   :  { %113 = vsyncpa [#allocation4], 1 }

</bundles_post_ra>
